<compile_context>
chip_gen: v6e
topology: v6e:2x2x1
jax: 0.10.0
libtpu: 0.0.40
codegen_flags: <defaults>
</compile_context>

<pallas_src>
import functools

import jax
import jax.numpy as jnp
from jax.experimental import pallas as pl
from jax.experimental.pallas import tpu as pltpu

LANE = 128         # lane width (last-dim alignment)
SUBLANE = 8        # f32 sublane count
SEG_ALIGN = 16     # bf16 packs 16 rows / vreg -> align packed-param segments
HIDDEN = 50        # hidden width of the torch module
BATCH_TILE = 1024  # target rows per grid step for the large-batch path
MIN_SPLIT = 64     # batches >= this always use >= 2 grid steps (v7x megacore)


def _cdiv(a, b):
    return -(-a // b)


def _round_up(n, m):
    return _cdiv(n, m) * m


def _param_offsets(obs_size):
    """Row offsets of w1/b1/w2/b2/w3/b3 in the packed (rows, 128) bf16 buffer.
    Every segment starts on a 16-row boundary; biases use row 0 of their slot."""
    obs_rows = _round_up(obs_size, SEG_ALIGN)
    ow1 = 0
    ob1 = ow1 + obs_rows
    ow2 = ob1 + SEG_ALIGN
    ob2 = ow2 + LANE
    ow3 = ob2 + SEG_ALIGN
    ob3 = ow3 + LANE
    total = ob3 + SEG_ALIGN
    return (ow1, ob1, ow2, ob2, ow3, ob3), total


def _qfunc_kernel(x_ref, p_ref, o_ref, *, obs_size, n_actions, offs):
    ow1, ob1, ow2, ob2, ow3, ob3 = offs
    f32 = jnp.float32
    bf16 = jnp.bfloat16

    x = x_ref[...].astype(bf16)                                   # (tb, obs)
    # layer 1: Linear(obs -> hidden) + ReLU   (K = obs_size, not 128)
    h = jnp.dot(x, p_ref[ow1:ow1 + obs_size, :],
                preferred_element_type=f32)                       # (tb, 128)
    h = jnp.maximum(h + p_ref[ob1:ob1 + 1, :].astype(f32), 0.0)
    # layer 2: Linear(hidden -> hidden) + ReLU
    h = jnp.dot(h.astype(bf16), p_ref[ow2:ow2 + LANE, :],
                preferred_element_type=f32)
    h = jnp.maximum(h + p_ref[ob2:ob2 + 1, :].astype(f32), 0.0)
    # layer 3: Linear(hidden -> actions), no activation
    q = jnp.dot(h.astype(bf16), p_ref[ow3:ow3 + LANE, :],
                preferred_element_type=f32)
    q = q + p_ref[ob3:ob3 + 1, :].astype(f32)
    # narrow store: only the real action lanes go back to HBM
    o_ref[...] = q[:, :n_actions].astype(o_ref.dtype)


def init_linear(key, fan_in, fan_out):
    """PyTorch-default-style init: U(-1/sqrt(fan_in), 1/sqrt(fan_in)).
    Returns (W^T of shape (fan_in, fan_out), b of shape (1, fan_out))."""
    kw, kb = jax.random.split(key)
    bound = 1.0 / (fan_in ** 0.5)
    w_t = jax.random.uniform(kw, (fan_in, fan_out), jnp.float32, -bound, bound)
    b = jax.random.uniform(kb, (1, fan_out), jnp.float32, -bound, bound)
    return w_t, b


def pack_params(params, obs_size, n_actions):
    """Pack all weights + biases into one contiguous (rows, 128) bf16 buffer
    (single grid-invariant DMA, VMEM-resident across all grid steps)."""
    (w1, b1), (w2, b2), (w3, b3) = params
    assert HIDDEN <= LANE and n_actions <= LANE, "packing assumes widths <= 128"
    offs, total = _param_offsets(obs_size)
    ow1, ob1, ow2, ob2, ow3, ob3 = offs
    buf = jnp.zeros((total, LANE), jnp.float32)
    buf = buf.at[ow1:ow1 + obs_size, :HIDDEN].set(w1)
    buf = buf.at[ob1, :HIDDEN].set(b1.reshape(-1))
    buf = buf.at[ow2:ow2 + HIDDEN, :HIDDEN].set(w2)
    buf = buf.at[ob2, :HIDDEN].set(b2.reshape(-1))
    buf = buf.at[ow3:ow3 + HIDDEN, :n_actions].set(w3)
    buf = buf.at[ob3, :n_actions].set(b3.reshape(-1))
    return buf.astype(jnp.bfloat16)


@functools.partial(jax.jit, static_argnames=("obs_size", "n_actions"))
def qfunction_forward(x, packed, *, obs_size, n_actions):
    """Fused MLP forward. x: (B, obs_size) f32. Returns q-values (B, n_actions)."""
    B = x.shape[0]
    assert x.shape[1] == obs_size
    offs, total = _param_offsets(obs_size)
    assert packed.shape == (total, LANE) and packed.dtype == jnp.bfloat16

    # Balanced batch tiling: one fused step for tiny B; >= 2 steps once B is
    # big enough (keeps both v7x TensorCores busy); ~BATCH_TILE rows per step
    # for huge B with minimal remainder padding.
    n_steps = _cdiv(B, BATCH_TILE)
    if n_steps == 1 and B >= MIN_SPLIT:
        n_steps = 2
    if n_steps == 1:
        tb = B                                   # full-array block, no padding
    else:
        tb = _round_up(_cdiv(B, n_steps), SUBLANE)
    b_pad = n_steps * tb

    x_in = x if b_pad == B else jnp.pad(x, ((0, b_pad - B), (0, 0)))

    kernel = functools.partial(_qfunc_kernel, obs_size=obs_size,
                               n_actions=n_actions, offs=offs)
    out = pl.pallas_call(
        kernel,
        out_shape=jax.ShapeDtypeStruct((b_pad, n_actions), jnp.float32),
        grid=(n_steps,),
        in_specs=[
            pl.BlockSpec((tb, obs_size), lambda i: (i, 0)),   # natural-width x tile
            pl.BlockSpec((total, LANE), lambda i: (0, 0)),    # params, grid-invariant
        ],
        out_specs=pl.BlockSpec((tb, n_actions), lambda i: (i, 0)),
        compiler_params=pltpu.CompilerParams(
            dimension_semantics=("parallel",)),               # megacore on v7x
    )(x_in, packed)
    return out if b_pad == B else out[:B]
    # TODO(synk): pfrl.action_value.DiscreteActionValue is a Python wrapper
    # object (greedy action / max-Q helpers); we return the raw q-value tensor.


if __name__ == "__main__":
    # Small shapes consistent with the module: obs_size=32, n_actions=5.
    obs_size, n_actions = 32, 5

    key = jax.random.PRNGKey(0)
    k1, k2, k3, kx_small, kx_big = jax.random.split(key, 5)

    params = (
        init_linear(k1, obs_size, HIDDEN),
        init_linear(k2, HIDDEN, HIDDEN),
        init_linear(k3, HIDDEN, n_actions),
    )
    packed = jax.device_put(pack_params(params, obs_size, n_actions))

    def reference(x):
        (w1, b1), (w2, b2), (w3, b3) = params
        h = jnp.maximum(x @ w1 + b1, 0.0)
        h = jnp.maximum(h @ w2 + b2, 0.0)
        return h @ w3 + b3

    # batch=8: single fused step, no padding.  batch=200: 2 balanced grid
    # steps + row-remainder padding (exercises the megacore / pad path).
    for kx, batch in ((kx_small, 8), (kx_big, 200)):
        x = jax.random.normal(kx, (batch, obs_size), jnp.float32)
        q = qfunction_forward(x, packed, obs_size=obs_size, n_actions=n_actions)
        q = jax.block_until_ready(q)
        assert q.shape == (batch, n_actions)
        ref = reference(x)
        # bf16 matmul operands with f32 accumulation -> relaxed tolerance.
        assert jnp.allclose(q, ref, atol=5e-2, rtol=5e-2), (
            batch, float(jnp.max(jnp.abs(q - ref))))

    print("KERNEL_OK")
</pallas_src>

<mosaic_0001>
module attributes {stable_mosaic.version = 11 : i64} {
  func.func @_qfunc_kernel(%arg0: i32, %arg1: memref<8x32xf32, #tpu.memory_space<vmem>>, %arg2: memref<336x128xbf16, #tpu.memory_space<vmem>>, %arg3: memref<8x5xf32, #tpu.memory_space<vmem>>) attributes {dimension_semantics = [#tpu.dimension_semantics<parallel>], iteration_bounds = array<i64: 1>, scalar_prefetch = 0 : i64, scratch_operands = 0 : i64, tpu.core_type = #tpu.core_type<tc>, window_params = [{transform_indices = @transform_0, window_bounds = array<i64: 8, 32>}, {pipeline_mode = #tpu.pipeline_mode<synchronous>, transform_indices = @transform_1, window_bounds = array<i64: 336, 128>}, {transform_indices = @transform_2, window_bounds = array<i64: 8, 5>}]} {
    %c0 = arith.constant 0 : index
    %c0_0 = arith.constant 0 : index
    %0 = vector.load %arg1[%c0, %c0_0] : memref<8x32xf32, #tpu.memory_space<vmem>>, vector<8x32xf32>
    %1 = arith.truncf %0 : vector<8x32xf32> to vector<8x32xbf16>
    %c0_1 = arith.constant 0 : index
    %c0_2 = arith.constant 0 : index
    %2 = vector.load %arg2[%c0_1, %c0_2] : memref<336x128xbf16, #tpu.memory_space<vmem>>, vector<32x128xbf16>
    %cst = arith.constant dense<0.000000e+00> : vector<8x128xf32>
    %3 = tpu.matmul %1, %2, %cst {dimension_numbers = #tpu.dot_dimension_numbers<[1], [0], [0], [1], [0, 0, 1, 1], [], []>} : vector<8x32xbf16>, vector<32x128xbf16>, vector<8x128xf32> -> vector<8x128xf32>
    %c32 = arith.constant 32 : index
    %c0_3 = arith.constant 0 : index
    %4 = vector.load %arg2[%c32, %c0_3] : memref<336x128xbf16, #tpu.memory_space<vmem>>, vector<1x128xbf16>
    %5 = arith.extf %4 : vector<1x128xbf16> to vector<1x128xf32>
    %6 = vector.broadcast %5 : vector<1x128xf32> to vector<8x128xf32>
    %7 = arith.addf %3, %6 : vector<8x128xf32>
    %cst_4 = arith.constant 0.000000e+00 : f32
    %8 = vector.broadcast %cst_4 : f32 to vector<8x128xf32>
    %9 = arith.maximumf %7, %8 : vector<8x128xf32>
    %10 = arith.truncf %9 : vector<8x128xf32> to vector<8x128xbf16>
    %c48 = arith.constant 48 : index
    %c0_5 = arith.constant 0 : index
    %11 = vector.load %arg2[%c48, %c0_5] : memref<336x128xbf16, #tpu.memory_space<vmem>>, vector<128x128xbf16>
    %cst_6 = arith.constant dense<0.000000e+00> : vector<8x128xf32>
    %12 = tpu.matmul %10, %11, %cst_6 {dimension_numbers = #tpu.dot_dimension_numbers<[1], [0], [0], [1], [0, 0, 1, 1], [], []>} : vector<8x128xbf16>, vector<128x128xbf16>, vector<8x128xf32> -> vector<8x128xf32>
    %c176 = arith.constant 176 : index
    %c0_7 = arith.constant 0 : index
    %13 = vector.load %arg2[%c176, %c0_7] : memref<336x128xbf16, #tpu.memory_space<vmem>>, vector<1x128xbf16>
    %14 = arith.extf %13 : vector<1x128xbf16> to vector<1x128xf32>
    %15 = vector.broadcast %14 : vector<1x128xf32> to vector<8x128xf32>
    %16 = arith.addf %12, %15 : vector<8x128xf32>
    %cst_8 = arith.constant 0.000000e+00 : f32
    %17 = vector.broadcast %cst_8 : f32 to vector<8x128xf32>
    %18 = arith.maximumf %16, %17 : vector<8x128xf32>
    %19 = arith.truncf %18 : vector<8x128xf32> to vector<8x128xbf16>
    %c192 = arith.constant 192 : index
    %c0_9 = arith.constant 0 : index
    %20 = vector.load %arg2[%c192, %c0_9] : memref<336x128xbf16, #tpu.memory_space<vmem>>, vector<128x128xbf16>
    %cst_10 = arith.constant dense<0.000000e+00> : vector<8x128xf32>
    %21 = tpu.matmul %19, %20, %cst_10 {dimension_numbers = #tpu.dot_dimension_numbers<[1], [0], [0], [1], [0, 0, 1, 1], [], []>} : vector<8x128xbf16>, vector<128x128xbf16>, vector<8x128xf32> -> vector<8x128xf32>
    %c320 = arith.constant 320 : index
    %c0_11 = arith.constant 0 : index
    %22 = vector.load %arg2[%c320, %c0_11] : memref<336x128xbf16, #tpu.memory_space<vmem>>, vector<1x128xbf16>
    %23 = arith.extf %22 : vector<1x128xbf16> to vector<1x128xf32>
    %24 = vector.broadcast %23 : vector<1x128xf32> to vector<8x128xf32>
    %25 = arith.addf %21, %24 : vector<8x128xf32>
    %26 = vector.extract_strided_slice %25 {offsets = [0, 0], sizes = [8, 5], strides = [1, 1]} : vector<8x128xf32> to vector<8x5xf32>
    %c0_12 = arith.constant 0 : index
    %c0_13 = arith.constant 0 : index
    %27 = vector.load %arg3[%c0_12, %c0_13] : memref<8x5xf32, #tpu.memory_space<vmem>>, vector<8x5xf32>
    tpu.vector_store %arg3[%c0_12, %c0_13], %26 {strides = array<i32>} : memref<8x5xf32, #tpu.memory_space<vmem>>, vector<8x5xf32>,
    return
  }
  func.func @transform_0(%arg0: i32) -> (i32, i32) {
    %c0_i32 = arith.constant 0 : i32
    %c0_i32_0 = arith.constant 0 : i32
    return %arg0, %c0_i32 : i32, i32
  }
  func.func @transform_1(%arg0: i32) -> (i32, i32) {
    %c0_i32 = arith.constant 0 : i32
    %c0_i32_0 = arith.constant 0 : i32
    %c0_i32_1 = arith.constant 0 : i32
    return %c0_i32, %c0_i32_0 : i32, i32
  }
  func.func @transform_2(%arg0: i32) -> (i32, i32) {
    %c0_i32 = arith.constant 0 : i32
    %c0_i32_0 = arith.constant 0 : i32
    return %arg0, %c0_i32 : i32, i32
  }
}

</mosaic_0001>

<bundles_post_ra>
// kernel: qfunction_forward.1
= control target key start
LH: loop header
LB: loop body
LE: loop exit
PB: predicated region body
PF: predicated region fallthrough
CT: control target
= control target key end

     0   :  { %7 = vsyncpa [#allocation3], 0  ;;  %s583_s0 = inlined_call_operand.hbm [shape: f32[8,32], index: 0, kind: input, shape index: {}]   ;;  %s584_s1 = inlined_call_operand.hbm [shape: bf16[336,128], index: 1, kind: input, shape index: {}]   ;;  %s585_s2 = inlined_call_operand.hbm [shape: f32[8,5], index: 2, kind: output, shape index: {}]  }
   0x1   :  { %8 = vsyncpa [#allocation6], 0 }
   0x2   :  { %9 = vsyncpa [#allocation4], 0  ;;  %s528_s9 = smov [#allocation2]   ;;  %s529_s11 = smov [#allocation5]  }
   0x3   :  { %s16_s10 = sshll.u32 %s528_s9, 4  ;;  %s25_s12 = sshll.u32 %s529_s11, 4  ;;  %s17_s10 = int_to_ptr.vmem [resolvable:$true] %s16_s10  ;;  %s26_s12 = int_to_ptr.vmem [resolvable:$true] %s25_s12 }
   0x4   :  { %s470_s13 = scalar_lea.vmem %s17_s10, 128  ;;  %p475_p1 = scmp.lt.s32.totalorder %s17_s10, %s17_s10 }
   0x5   :  { %p471_p0 = scmp.ne.s32.totalorder %s17_s10, %s470_s13  ;;  %p476_p2 = scmp.lt.s32.totalorder %s470_s13, %s470_s13 }
   0x7   :  { %p477_p3 = por %p476_p2, %p475_p1 }
   0x9   :  { %p478_p4 = pnand %p477_p3, %p471_p0 }
   0xb   :  { %481 = shalt.err (!%p478_p4)
}
   0xc   :  { %19 = dma.hbm_to_vmem [thread:$0]  %s583_s0, 128, %s17_s10, [#allocation3]  }
   0xd   :  { %s490_s16 = scalar_lea.vmem %s26_s12, 2688  ;;  %p495_p6 = scmp.lt.s32.totalorder %s26_s12, %s26_s12 }
   0xe   :  { %p491_p5 = scmp.ne.s32.totalorder %s26_s12, %s490_s16  ;;  %p496_p7 = scmp.lt.s32.totalorder %s490_s16, %s490_s16 }
  0x10   :  { %p497_p8 = por %p496_p7, %p495_p6 }
  0x12   :  { %p498_p9 = pnand %p497_p8, %p491_p5 }
  0x14   :  { %501 = shalt.err (!%p498_p9)
}
  0x15   :  { %s530_s17 = smov 64   ;;  %s531_s18 = smov 4  }
  0x16   :  { %31 = dma.hbm_to_vmem [thread:$0]  %s584_s1, 2688, %s26_s12, [#allocation6], %s530_s17, %s530_s17, %s531_s18  }
  0x17   :  { %522 = dma.done.wait [#allocation3], 128  }
  0x18   :  { %523 = vsyncadd [#allocation3], 4294967168 }
  0x19   :  { %524 = dma.done.wait [#allocation6], 2688  }
  0x1a   :  { %525 = vsyncadd [#allocation6], 4294964608  ;;  %v532_v0 = vmov 0.0   ;;  %vm533_vm0 = vmmov 0   ;;  %v444_v1 = vld [vmem:[#allocation5 + $0x8] sm:$0xff]   ;;  %v445_v2 = vld [vmem:[#allocation5] sm:$0xff]   ;;  %v47_v19 = vlaneseq }
  0x1b   :  { %389 = vmatprep.subr.bf16.mxu0 %v532_v0  ;;  %393 = vmatprep.mubr.msk.bf16.mxu0 %vm533_vm0, %v532_v0  ;;  %v39_v3 = vld [vmem:[#allocation2] sm:$0xff]  ;;  %v446_v4 = vld [vmem:[#allocation5 + $0x50] sm:$0xff]   ;;  %v447_v6 = vld [vmem:[#allocation5 + $0x48] sm:$0xff]   ;;  %vm63_vm1 = vcmask 261120   ;;  %s534_s0 = smov [#allocation7]   ;;  %vm331_vm2 = vcmask 39936  }
  0x1c   :  { %397 = vmatprep.subr.bf16.mxu1 %v532_v0  ;;  %413 = vmatprep.mubr.msk.bf16.mxu1 %vm533_vm0, %v532_v0  ;;  %v40_v5 = vpack.c.bf16 %v39_v3, %v39_v3  ;;  %v448_v7 = vld [vmem:[#allocation5 + $0x40] sm:$0xff]   ;;  %v449_v8 = vld [vmem:[#allocation5 + $0x38] sm:$0xff]   ;;  %v450_v9 = vld [vmem:[#allocation5 + $0x30] sm:$0xff]   ;;  %v48_v20 = vshrl.u32 %v47_v19, 7  ;;  %s339_s1 = sshll.u32 %s534_s0, 4  ;;  %s340_s1 = int_to_ptr.vmem [resolvable:$true] %s339_s1 }
  0x1d   :  { %390 = vmatpush3.bf16.msra.mxu0 %v444_v1  ;;  %398 = vmatpush3.bf16.msra.mxu1 %v446_v4  ;;  %v451_v10 = vld [vmem:[#allocation5 + $0x28] sm:$0xff]   ;;  %v452_v11 = vld [vmem:[#allocation5 + $0x20] sm:$0xff]   ;;  %v453_v12 = vld [vmem:[#allocation5 + $0x18] sm:$0xff]   ;;  %s502_s21 = scalar_lea.vmem %s340_s1, 128  ;;  %p507_p11 = scmp.lt.s32.totalorder %s340_s1, %s340_s1 }
  0x1e   :  { %391 = vmatprep.subr.bf16.mxu0 %v532_v0  ;;  %399 = vmatprep.subr.bf16.mxu1 %v532_v0  ;;  %v454_v13 = vld [vmem:[#allocation5 + $0x98] sm:$0xff]   ;;  %v455_v14 = vld [vmem:[#allocation5 + $0x90] sm:$0xff]   ;;  %v456_v15 = vld [vmem:[#allocation5 + $0x88] sm:$0xff]   ;;  %v49_v23 = vsub.s32 0, %v48_v20  ;;  %p503_p10 = scmp.ne.s32.totalorder %s340_s1, %s502_s21  ;;  %p508_p12 = scmp.lt.s32.totalorder %s502_s21, %s502_s21 }
  0x1f   :  { %v457_v16 = vld [vmem:[#allocation5 + $0x80] sm:$0xff]   ;;  %v458_v17 = vld [vmem:[#allocation5 + $0x78] sm:$0xff]   ;;  %v459_v18 = vld [vmem:[#allocation5 + $0x70] sm:$0xff]  }
  0x20   :  { %v45_v21 = vld [vmem:[#allocation5 + $0x10] sm:$0x1]  ;;  %v460_v32 = vld [vmem:[#allocation5 + $0x68] sm:$0xff]   ;;  %v461_v33 = vld [vmem:[#allocation5 + $0x60] sm:$0xff]   ;;  %p509_p13 = por %p508_p12, %p507_p11 }
  0x21   :  { %392 = vmatpush3.bf16.msra.mxu0 %v445_v2  ;;  %400 = vmatpush3.bf16.msra.mxu1 %v447_v6  ;;  %v46_v22 = vunpack.c.l.bf16 %v45_v21  ;;  %v125_v34 = vld [vmem:[#allocation5 + $0x58] sm:$0x1]  ;;  %v237_v44 = vld [vmem:[#allocation5 + $0xa0] sm:$0x1] }
  0x22   :  { %417 = vmatprep.subr.bf16.mxu0 %v532_v0  ;;  %401 = vmatprep.subr.bf16.mxu1 %v532_v0  ;;  %v126_v35 = vunpack.c.l.bf16 %v125_v34  ;;  %v238_v45 = vunpack.c.l.bf16 %v237_v44  ;;  %p510_p0 = pnand %p509_p13, %p503_p10 }
  0x23   :  { %v50_v24 = vrot.slane %v46_v22, %v49_v23 }
  0x24   :  { %394 = vmatmul.mubr.msk.bf16.vlgmr.msra.gmra.mxu0 %vm63_vm1, %v40_v5  ;;  %v130_v36 = vrot.slane %v126_v35, %v49_v23  ;;  %v242_v46 = vrot.slane %v238_v45, %v49_v23 }
  0x25   :  { %433 = vmatprep.mubr.msk.bf16.mxu0 %vm533_vm0, %v532_v0  ;;  %402 = vmatpush3.bf16.msra.mxu1 %v448_v7 }
  0x26   :  { %403 = vmatprep.subr.bf16.mxu1 %v532_v0  ;;  %418 = vmatpush3.bf16.msra.mxu0 %v454_v13 }
  0x27   :  { %419 = vmatprep.subr.bf16.mxu0 %v532_v0 }
  0x29   :  { %404 = vmatpush3.bf16.msra.mxu1 %v449_v8 }
  0x2a   :  { %405 = vmatprep.subr.bf16.mxu1 %v532_v0  ;;  %420 = vmatpush3.bf16.msra.mxu0 %v455_v14 }
  0x2b   :  { %421 = vmatprep.subr.bf16.mxu0 %v532_v0 }
  0x2d   :  { %406 = vmatpush3.bf16.msra.mxu1 %v450_v9 }
  0x2e   :  { %407 = vmatprep.subr.bf16.mxu1 %v532_v0  ;;  %422 = vmatpush3.bf16.msra.mxu0 %v456_v15 }
  0x2f   :  { %423 = vmatprep.subr.bf16.mxu0 %v532_v0 }
  0x31   :  { %408 = vmatpush3.bf16.msra.mxu1 %v451_v10 }
  0x32   :  { %409 = vmatprep.subr.bf16.mxu1 %v532_v0  ;;  %424 = vmatpush3.bf16.msra.mxu0 %v457_v16 }
  0x33   :  { %425 = vmatprep.subr.bf16.mxu0 %v532_v0 }
  0x35   :  { %410 = vmatpush3.bf16.msra.mxu1 %v452_v11 }
  0x36   :  { %411 = vmatprep.subr.bf16.mxu1 %v532_v0  ;;  %426 = vmatpush3.bf16.msra.mxu0 %v458_v17 }
  0x37   :  { %427 = vmatprep.subr.bf16.mxu0 %v532_v0 }
  0x39   :  { %412 = vmatpush3.bf16.msra.mxu1 %v453_v12 }
  0x3a   :  { %428 = vmatpush3.bf16.msra.mxu0 %v459_v18 }
  0x3b   :  { %429 = vmatprep.subr.bf16.mxu0 %v532_v0 }
  0x3e   :  { %430 = vmatpush3.bf16.msra.mxu0 %v460_v32 }
  0x3f   :  { %431 = vmatprep.subr.bf16.mxu0 %v532_v0 }
  0x42   :  { %432 = vmatpush3.bf16.msra.mxu0 %v461_v33 }
  0xe4   :  { %v101_v25 = vpop.f32.mrf.mxu0 }
  0xe5   :  { %v102_v26 = vadd.f32 %v101_v25, %v50_v24 }
  0xe6   :  { %v395_v27 = vpop.f32.mrf.mxu0 }
  0xe7   :  { %v107_v28 = vmax.f32 %v102_v26, 0.0 }
  0xe8   :  { %v104_v29 = vpop.f32.mrf.mxu0 }
  0xe9   :  { %v108_v30 = vpack.c.bf16 %v107_v28, %v107_v28 }
  0xea   :  { %v396_v31 = vpop.f32.mrf.mxu0 }
  0xeb   :  { %414 = vmatmul.mubr.bf16.vlgmr.msra.gmra.mxu1 %v108_v30 }
 0x1ab   :  { %v213_v37 = vpop.f32.mrf.mxu1 }
 0x1ac   :  { %v214_v38 = vadd.f32 %v213_v37, %v130_v36 }
 0x1ad   :  { %v415_v39 = vpop.f32.mrf.mxu1 }
 0x1ae   :  { %v219_v40 = vmax.f32 %v214_v38, 0.0 }
 0x1af   :  { %v216_v41 = vpop.f32.mrf.mxu1 }
 0x1b0   :  { %v220_v42 = vpack.c.bf16 %v219_v40, %v219_v40 }
 0x1b1   :  { %v416_v43 = vpop.f32.mrf.mxu1 }
 0x1b2   :  { %434 = vmatmul.mubr.bf16.vlgmr.msra.gmra.mxu0 %v220_v42 }
 0x272   :  { %v325_v47 = vpop.f32.mrf.mxu0 }
 0x273   :  { %v326_v48 = vadd.f32 %v325_v47, %v242_v46 }
 0x274   :  { %v435_v49 = vpop.f32.mrf.mxu0 }
 0x275   :  { %332 = vst.msk [vmem:[#allocation7] sm:$0xff] %vm331_vm2, %v326_v48 }
 0x276   :  { %v328_v50 = vpop.f32.mrf.mxu0 }
 0x277   :  { %513 = shalt.err (!%p510_p0)
}
 0x278   :  { %342 = dma.vmem_to_hbm [thread:$0]  %s340_s1, 128, %s585_s2, [#allocation4]   ;;  %v436_v51 = vpop.f32.mrf.mxu0 }
 0x279   :  { %526 = dma.done.wait [#allocation4], 128  }
 0x27a   :  { %527 = vsyncadd [#allocation4], 4294967168 }
 0x27b   :  { %346 = vsyncpa [#allocation3], 1 }
 0x27c   :  { %347 = vsyncpa [#allocation6], 1 }
 0x27d   :  { %348 = vsyncpa [#allocation4], 1 }

</bundles_post_ra>
